<compile_context>
chip_gen: v6e
topology: v6e:2x2x1
jax: 0.10.0
libtpu: 0.0.40
codegen_flags: <defaults>
</compile_context>

<pallas_src>
import math

import numpy as np

import jax
import jax.numpy as jnp
from jax import lax
from jax.experimental import pallas as pl
from jax.experimental.pallas import tpu as pltpu

LN_EPS = 1e-5
_INV_SQRT2 = 1.0 / math.sqrt(2.0)


def _round_up(n, m):
    return ((n + m - 1) // m) * m


def _gelu(x):
    # Exact GELU (PyTorch nn.GELU default): 0.5*x*(1+erf(x/sqrt(2))); erf -> EUP.
    return 0.5 * x * (1.0 + lax.erf(x * jnp.float32(_INV_SQRT2)))


# ---------------------------------------------------------------------------
# 1) proj_block: Linear(F, F) -> LayerNorm(F) -> GELU
# ---------------------------------------------------------------------------
def _proj_kernel(x_ref, w_ref, b_ref, g_ref, beta_ref, o_ref):
    # x_ref: (TM, F) bf16   w_ref: (F, F) bf16 (resident)   b/g/beta: (1, F) f32
    y = jnp.dot(x_ref[...], w_ref[...], preferred_element_type=jnp.float32)
    y = y + b_ref[...]
    mean = jnp.mean(y, axis=-1, keepdims=True)
    cen = y - mean
    var = jnp.mean(cen * cen, axis=-1, keepdims=True)
    y = cen * lax.rsqrt(var + LN_EPS) * g_ref[...] + beta_ref[...]
    o_ref[...] = _gelu(y)


def proj_forward(x, w, b, gamma, beta, *, tm_max=256, vmem_limit_bytes=None):
    """x: (B, F) -> (B, F) f32.  `w` is (in, out) = torch Linear.weight.T."""
    B, F = x.shape
    # Batch tile: large enough to pipeline HBM<->VMEM, capped at 256 rows so
    # double-buffered bf16 tiles fit the default scoped VMEM on v5e / v7x.
    # (On v6e, raise tm_max and vmem_limit_bytes for a slightly deeper tile.)
    tm = min(tm_max, _round_up(B, 8))
    Bp = _round_up(B, tm)                 # pad so every tile is full

    xb = x.astype(jnp.bfloat16)           # bf16 feed halves the dominant stream
    if Bp != B:
        xb = jnp.pad(xb, ((0, Bp - B), (0, 0)))
    wb = w.astype(jnp.bfloat16)
    b2 = b.reshape(1, F).astype(jnp.float32)
    g2 = gamma.reshape(1, F).astype(jnp.float32)
    be2 = beta.reshape(1, F).astype(jnp.float32)

    cost = pl.CostEstimate(
        flops=2 * Bp * F * F,
        transcendentals=Bp * F,
        bytes_accessed=Bp * F * 2 + F * F * 2 + 3 * F * 4 + Bp * F * 4,
    )
    out = pl.pallas_call(
        _proj_kernel,
        out_shape=jax.ShapeDtypeStruct((Bp, F), jnp.float32),
        grid=(Bp // tm,),
        in_specs=[
            pl.BlockSpec((tm, F), lambda i: (i, 0)),
            pl.BlockSpec((F, F), lambda i: (0, 0)),    # weight stays resident
            pl.BlockSpec((1, F), lambda i: (0, 0)),
            pl.BlockSpec((1, F), lambda i: (0, 0)),
            pl.BlockSpec((1, F), lambda i: (0, 0)),
        ],
        out_specs=pl.BlockSpec((tm, F), lambda i: (i, 0)),
        compiler_params=pltpu.CompilerParams(
            dimension_semantics=("parallel",),         # v7x dual-TC sharding
            vmem_limit_bytes=vmem_limit_bytes,
        ),
        cost_estimate=cost,
    )(xb, wb, b2, g2, be2)
    return out[:B]


# ---------------------------------------------------------------------------
# 2) decoder stage: Upsample(2x bilinear) -> Conv3x3 'same' -> LN([C,H,W]) -> GELU
# ---------------------------------------------------------------------------
def _bilinear_matrix(n):
    """(2n, n) matrix matching nn.Upsample(scale_factor=2, mode='bilinear',
    align_corners=False)."""
    m = np.zeros((2 * n, n), np.float32)
    for o in range(2 * n):
        src = max((o + 0.5) * 0.5 - 0.5, 0.0)
        i0 = int(math.floor(src))
        i1 = min(i0 + 1, n - 1)
        f = src - i0
        m[o, i0] += 1.0 - f
        m[o, i1] += f
    return m


def _upsample_conv_taps(H, W):
    """(9, 4HW, HW): tap k=ky*3+kx maps the flattened (H,W) input to the
    zero-padded, (ky,kx)-shifted, 2x-upsampled image flattened over (2H,2W),
    so the 3x3 'same' conv on the upsampled image becomes sum_k (A_k @ x) @ W_k."""
    up = np.kron(_bilinear_matrix(H), _bilinear_matrix(W))        # (4HW, HW)
    img = up.reshape(2 * H, 2 * W, H * W)
    pad = np.pad(img, ((1, 1), (1, 1), (0, 0)))
    taps = np.zeros((9, 4 * H * W, H * W), np.float32)
    for ky in range(3):
        for kx in range(3):
            taps[ky * 3 + kx] = pad[ky:ky + 2 * H, kx:kx + 2 * W, :].reshape(
                4 * H * W, H * W)
    return jnp.asarray(taps)


def _decoder_stage_kernel(x_ref, a_ref, w_ref, b_ref, g_ref, beta_ref, o_ref):
    # x_ref: (1, HW, Cin)   a_ref: (9, 4HW, HW)   w_ref: (9, Cin, Cout)
    # b_ref: (1, Cout)      g/beta: (1, 4HW, Cout)   o_ref: (1, 4HW, Cout)
    x = x_ref[0]
    hw4, cout = o_ref.shape[1], o_ref.shape[2]
    acc = jnp.zeros((hw4, cout), jnp.float32)
    for k in range(9):                               # static unroll: 9 conv taps
        ux = jnp.dot(a_ref[k], x, preferred_element_type=jnp.float32)
        acc = acc + jnp.dot(ux, w_ref[k], preferred_element_type=jnp.float32)
    y = acc + b_ref[...]
    # LayerNorm([Cout, 2H, 2W]): per-sample mean/var over every element.
    n = hw4 * cout
    mean = jnp.sum(jnp.sum(y, axis=1, keepdims=True), axis=0, keepdims=True) / n
    cen = y - mean
    var = jnp.sum(jnp.sum(cen * cen, axis=1, keepdims=True), axis=0, keepdims=True) / n
    y = cen * lax.rsqrt(var + LN_EPS)
    y = y * g_ref[0] + beta_ref[0]
    o_ref[0] = _gelu(y)


def decoder_stage_forward(x_cl, H, W, w_conv, b_conv, gamma, beta):
    """One decoder stage, channels-last: (B, H*W, Cin) -> (B, 4*H*W, Cout)."""
    B, HW, Cin = x_cl.shape
    assert HW == H * W
    Cout = w_conv.shape[0]
    H2, W2 = 2 * H, 2 * W
    HW4 = H2 * W2

    taps = _upsample_conv_taps(H, W)                                       # (9, HW4, HW)
    w_taps = jnp.transpose(w_conv, (2, 3, 1, 0)).reshape(9, Cin, Cout).astype(jnp.float32)
    b2 = b_conv.reshape(1, Cout).astype(jnp.float32)
    g2 = jnp.transpose(gamma, (1, 2, 0)).reshape(1, HW4, Cout).astype(jnp.float32)
    be2 = jnp.transpose(beta, (1, 2, 0)).reshape(1, HW4, Cout).astype(jnp.float32)

    out = pl.pallas_call(
        _decoder_stage_kernel,
        out_shape=jax.ShapeDtypeStruct((B, HW4, Cout), jnp.float32),
        grid=(B,),
        in_specs=[
            pl.BlockSpec((1, HW, Cin), lambda b: (b, 0, 0)),
            pl.BlockSpec((9, HW4, HW), lambda b: (0, 0, 0)),     # resident
            pl.BlockSpec((9, Cin, Cout), lambda b: (0, 0, 0)),
            pl.BlockSpec((1, Cout), lambda b: (0, 0)),
            pl.BlockSpec((1, HW4, Cout), lambda b: (0, 0, 0)),
            pl.BlockSpec((1, HW4, Cout), lambda b: (0, 0, 0)),
        ],
        out_specs=pl.BlockSpec((1, HW4, Cout), lambda b: (b, 0, 0)),
        compiler_params=pltpu.CompilerParams(
            dimension_semantics=("parallel",),
        ),
    )(x_cl.astype(jnp.float32), taps, w_taps, b2, g2, be2)
    return out, H2, W2


# ---------------------------------------------------------------------------
# 3) final 1x1 conv
# ---------------------------------------------------------------------------
def _final_conv_kernel(x_ref, w_ref, b_ref, o_ref):
    o_ref[0] = (jnp.dot(x_ref[0], w_ref[...], preferred_element_type=jnp.float32)
                + b_ref[...])


def final_conv_forward(x_cl, w_conv1x1, b_conv1x1):
    """1x1 conv, channels-last: (B, HW, Cin) -> (B, HW, out_sz)."""
    B, HW, Cin = x_cl.shape
    out_sz = w_conv1x1.shape[0]
    w2 = w_conv1x1.reshape(out_sz, Cin).T.astype(jnp.float32)   # (Cin, out_sz)
    b2 = b_conv1x1.reshape(1, out_sz).astype(jnp.float32)
    return pl.pallas_call(
        _final_conv_kernel,
        out_shape=jax.ShapeDtypeStruct((B, HW, out_sz), jnp.float32),
        grid=(B,),
        in_specs=[
            pl.BlockSpec((1, HW, Cin), lambda b: (b, 0, 0)),
            pl.BlockSpec((Cin, out_sz), lambda b: (0, 0)),
            pl.BlockSpec((1, out_sz), lambda b: (0, 0)),
        ],
        out_specs=pl.BlockSpec((1, HW, out_sz), lambda b: (b, 0, 0)),
        compiler_params=pltpu.CompilerParams(
            dimension_semantics=("parallel",),
        ),
    )(x_cl, w2, b2)


# ---------------------------------------------------------------------------
# full ConvDecoderLin forward
# ---------------------------------------------------------------------------
def conv_decoder_lin_forward(x, params):
    """x: (B, in_features) -> NCHW (B, out_sz, 4*2**n, 4*2**n)."""
    B = x.shape[0]
    z = proj_forward(x, params["w_lin"], params["b_lin"],
                     params["g_lin"], params["beta_lin"])
    # unsqueeze(-1).unsqueeze(-1).repeat(1,1,4,4), kept channels-last (B, 16, F)
    H = W = 4
    img = jnp.broadcast_to(z[:, None, :], (B, H * W, z.shape[1]))
    for (w_c, b_c, g_c, be_c) in params["stages"]:
        img, H, W = decoder_stage_forward(img, H, W, w_c, b_c, g_c, be_c)
    out_sz = params["w_final"].shape[0]
    out = final_conv_forward(img, params["w_final"], params["b_final"])
    return out.reshape(B, H, W, out_sz).transpose(0, 3, 1, 2)   # back to NCHW


# ---------------------------------------------------------------------------
# pure-JAX reference (independent code path) for a smoke check
# ---------------------------------------------------------------------------
def _upsample2x_ref(x_nchw):
    def idx(n):
        src = jnp.maximum((jnp.arange(2 * n, dtype=jnp.float32) + 0.5) * 0.5 - 0.5, 0.0)
        i0 = jnp.floor(src).astype(jnp.int32)
        i1 = jnp.minimum(i0 + 1, n - 1)
        return i0, i1, src - i0.astype(jnp.float32)
    _, _, H, W = x_nchw.shape
    i0, i1, fh = idx(H)
    x = (x_nchw[:, :, i0, :] * (1.0 - fh)[None, None, :, None]
         + x_nchw[:, :, i1, :] * fh[None, None, :, None])
    j0, j1, fw = idx(W)
    x = (x[:, :, :, j0] * (1.0 - fw)[None, None, None, :]
         + x[:, :, :, j1] * fw[None, None, None, :])
    return x


def _reference_forward(x, params):
    # proj (inputs rounded to bf16 exactly like the kernel feed)
    xb = x.astype(jnp.bfloat16).astype(jnp.float32)
    wb = params["w_lin"].astype(jnp.bfloat16).astype(jnp.float32)
    y = xb @ wb + params["b_lin"][None, :]
    mean = jnp.mean(y, axis=-1, keepdims=True)
    var = jnp.mean((y - mean) ** 2, axis=-1, keepdims=True)
    y = (y - mean) / jnp.sqrt(var + LN_EPS)
    y = y * params["g_lin"][None, :] + params["beta_lin"][None, :]
    y = _gelu(y)
    B, C = y.shape
    img = jnp.broadcast_to(y[:, :, None, None], (B, C, 4, 4))
    for (w_c, b_c, g_c, be_c) in params["stages"]:
        img = _upsample2x_ref(img)
        img = lax.conv_general_dilated(img, w_c, (1, 1), ((1, 1), (1, 1)),
                                       dimension_numbers=("NCHW", "OIHW", "NCHW"))
        img = img + b_c[None, :, None, None]
        mean = jnp.mean(img, axis=(1, 2, 3), keepdims=True)
        var = jnp.mean((img - mean) ** 2, axis=(1, 2, 3), keepdims=True)
        img = (img - mean) / jnp.sqrt(var + LN_EPS)
        img = img * g_c[None] + be_c[None]
        img = _gelu(img)
    img = lax.conv_general_dilated(img, params["w_final"], (1, 1), ((0, 0), (0, 0)),
                                   dimension_numbers=("NCHW", "OIHW", "NCHW"))
    return img + params["b_final"][None, :, None, None]


if __name__ == "__main__":
    key = jax.random.PRNGKey(0)
    ks = jax.random.split(key, 12)

    B = 2
    in_features = 32
    conv_channels = [16, 8]
    out_sz = 4

    x = jax.random.normal(ks[0], (B, in_features), dtype=jnp.float32)

    def uniform(k, shape, fan_in):
        bound = 1.0 / math.sqrt(fan_in)
        return jax.random.uniform(k, shape, minval=-bound, maxval=bound,
                                  dtype=jnp.float32)

    params = {}
    # Linear(in_features, in_features); stored as (in, out) = torch weight.T
    params["w_lin"] = uniform(ks[1], (in_features, in_features), in_features)
    params["b_lin"] = uniform(ks[2], (in_features,), in_features)
    params["g_lin"] = jnp.ones((in_features,), jnp.float32)
    params["beta_lin"] = jnp.zeros((in_features,), jnp.float32)

    dims = [in_features] + conv_channels
    sz = 4
    stages = []
    kidx = 3
    for i in range(len(dims) - 1):
        cin, cout = dims[i], dims[i + 1]
        sz *= 2
        fan_in = cin * 9
        w_c = uniform(ks[kidx], (cout, cin, 3, 3), fan_in); kidx += 1
        b_c = uniform(ks[kidx], (cout,), fan_in); kidx += 1
        g_c = jnp.ones((cout, sz, sz), jnp.float32)     # LayerNorm([C,H,W]) weight
        be_c = jnp.zeros((cout, sz, sz), jnp.float32)   # LayerNorm([C,H,W]) bias
        stages.append((w_c, b_c, g_c, be_c))
    params["stages"] = stages
    params["w_final"] = uniform(ks[kidx], (out_sz, conv_channels[-1], 1, 1),
                                conv_channels[-1]); kidx += 1
    params["b_final"] = uniform(ks[kidx], (out_sz,), conv_channels[-1])

    out = conv_decoder_lin_forward(x, params)
    out = jax.block_until_ready(out)

    ref = _reference_forward(x, params)
    assert out.shape == (B, out_sz, sz, sz), out.shape
    # Loose-ish tolerance: both paths run f32 matmuls/convs at the TPU's default
    # (bf16-pass) MXU precision, via different op decompositions.
    assert jnp.allclose(out, ref, atol=1e-1, rtol=1e-1), (
        "mismatch vs reference, max abs err "
        f"{float(jnp.max(jnp.abs(out - ref)))}")

    print("KERNEL_OK")
</pallas_src>

<mosaic_0001>
module attributes {stable_mosaic.version = 11 : i64} {
  func.func @_proj_kernel(%arg0: i32, %arg1: memref<8x32xbf16, #tpu.memory_space<vmem>>, %arg2: memref<32x32xbf16, #tpu.memory_space<vmem>>, %arg3: memref<1x32xf32, #tpu.memory_space<vmem>>, %arg4: memref<1x32xf32, #tpu.memory_space<vmem>>, %arg5: memref<1x32xf32, #tpu.memory_space<vmem>>, %arg6: memref<8x32xf32, #tpu.memory_space<vmem>>) attributes {dimension_semantics = [#tpu.dimension_semantics<parallel>], iteration_bounds = array<i64: 1>, scalar_prefetch = 0 : i64, scratch_operands = 0 : i64, tpu.core_type = #tpu.core_type<tc>, window_params = [{transform_indices = @transform_0, window_bounds = array<i64: 8, 32>}, {pipeline_mode = #tpu.pipeline_mode<synchronous>, transform_indices = @transform_1, window_bounds = array<i64: 32, 32>}, {pipeline_mode = #tpu.pipeline_mode<synchronous>, transform_indices = @transform_2, window_bounds = array<i64: 1, 32>}, {pipeline_mode = #tpu.pipeline_mode<synchronous>, transform_indices = @transform_3, window_bounds = array<i64: 1, 32>}, {pipeline_mode = #tpu.pipeline_mode<synchronous>, transform_indices = @transform_4, window_bounds = array<i64: 1, 32>}, {transform_indices = @transform_5, window_bounds = array<i64: 8, 32>}]} {
    %c0 = arith.constant 0 : index
    %c0_0 = arith.constant 0 : index
    %0 = vector.load %arg1[%c0, %c0_0] : memref<8x32xbf16, #tpu.memory_space<vmem>>, vector<8x32xbf16>
    %c0_1 = arith.constant 0 : index
    %c0_2 = arith.constant 0 : index
    %1 = vector.load %arg2[%c0_1, %c0_2] : memref<32x32xbf16, #tpu.memory_space<vmem>>, vector<32x32xbf16>
    %cst = arith.constant dense<0.000000e+00> : vector<8x32xf32>
    %2 = tpu.matmul %0, %1, %cst {dimension_numbers = #tpu.dot_dimension_numbers<[1], [0], [0], [1], [0, 0, 1, 1], [], []>} : vector<8x32xbf16>, vector<32x32xbf16>, vector<8x32xf32> -> vector<8x32xf32>
    %c0_3 = arith.constant 0 : index
    %c0_4 = arith.constant 0 : index
    %3 = vector.load %arg3[%c0_3, %c0_4] : memref<1x32xf32, #tpu.memory_space<vmem>>, vector<1x32xf32>
    %4 = vector.broadcast %3 : vector<1x32xf32> to vector<8x32xf32>
    %5 = arith.addf %2, %4 : vector<8x32xf32>
    %cst_5 = arith.constant dense<0.000000e+00> : vector<8xf32>
    %6 = vector.multi_reduction <add>, %5, %cst_5 [1] : vector<8x32xf32> to vector<8xf32>
    %7 = vector.shape_cast %6 : vector<8xf32> to vector<8x1xf32>
    %cst_6 = arith.constant 3.200000e+01 : f32
    %8 = vector.broadcast %cst_6 : f32 to vector<8x1xf32>
    %9 = arith.divf %7, %8 : vector<8x1xf32>
    %10 = vector.broadcast %9 : vector<8x1xf32> to vector<8x32xf32>
    %11 = arith.subf %5, %10 : vector<8x32xf32>
    %12 = arith.mulf %11, %11 : vector<8x32xf32>
    %cst_7 = arith.constant dense<0.000000e+00> : vector<8xf32>
    %13 = vector.multi_reduction <add>, %12, %cst_7 [1] : vector<8x32xf32> to vector<8xf32>
    %14 = vector.shape_cast %13 : vector<8xf32> to vector<8x1xf32>
    %cst_8 = arith.constant 3.200000e+01 : f32
    %15 = vector.broadcast %cst_8 : f32 to vector<8x1xf32>
    %16 = arith.divf %14, %15 : vector<8x1xf32>
    %cst_9 = arith.constant 9.99999974E-6 : f32
    %17 = vector.broadcast %cst_9 : f32 to vector<8x1xf32>
    %18 = arith.addf %16, %17 : vector<8x1xf32>
    %19 = math.rsqrt %18 : vector<8x1xf32>
    %20 = vector.broadcast %19 : vector<8x1xf32> to vector<8x32xf32>
    %21 = arith.mulf %11, %20 : vector<8x32xf32>
    %c0_10 = arith.constant 0 : index
    %c0_11 = arith.constant 0 : index
    %22 = vector.load %arg4[%c0_10, %c0_11] : memref<1x32xf32, #tpu.memory_space<vmem>>, vector<1x32xf32>
    %23 = vector.broadcast %22 : vector<1x32xf32> to vector<8x32xf32>
    %24 = arith.mulf %21, %23 : vector<8x32xf32>
    %c0_12 = arith.constant 0 : index
    %c0_13 = arith.constant 0 : index
    %25 = vector.load %arg5[%c0_12, %c0_13] : memref<1x32xf32, #tpu.memory_space<vmem>>, vector<1x32xf32>
    %26 = vector.broadcast %25 : vector<1x32xf32> to vector<8x32xf32>
    %27 = arith.addf %24, %26 : vector<8x32xf32>
    %cst_14 = arith.constant 5.000000e-01 : f32
    %28 = vector.broadcast %cst_14 : f32 to vector<8x32xf32>
    %29 = arith.mulf %28, %27 : vector<8x32xf32>
    %cst_15 = arith.constant 0.707106769 : f32
    %30 = vector.broadcast %cst_15 : f32 to vector<8x32xf32>
    %31 = arith.mulf %27, %30 : vector<8x32xf32>
    %32 = math.erf %31 : vector<8x32xf32>
    %cst_16 = arith.constant 1.000000e+00 : f32
    %33 = vector.broadcast %cst_16 : f32 to vector<8x32xf32>
    %34 = arith.addf %33, %32 : vector<8x32xf32>
    %35 = arith.mulf %29, %34 : vector<8x32xf32>
    %c0_17 = arith.constant 0 : index
    %c0_18 = arith.constant 0 : index
    %36 = vector.load %arg6[%c0_17, %c0_18] : memref<8x32xf32, #tpu.memory_space<vmem>>, vector<8x32xf32>
    tpu.vector_store %arg6[%c0_17, %c0_18], %35 {strides = array<i32>} : memref<8x32xf32, #tpu.memory_space<vmem>>, vector<8x32xf32>,
    return
  }
  func.func @transform_0(%arg0: i32) -> (i32, i32) {
    %c0_i32 = arith.constant 0 : i32
    %c0_i32_0 = arith.constant 0 : i32
    return %arg0, %c0_i32 : i32, i32
  }
  func.func @transform_1(%arg0: i32) -> (i32, i32) {
    %c0_i32 = arith.constant 0 : i32
    %c0_i32_0 = arith.constant 0 : i32
    %c0_i32_1 = arith.constant 0 : i32
    return %c0_i32, %c0_i32_0 : i32, i32
  }
  func.func @transform_2(%arg0: i32) -> (i32, i32) {
    %c0_i32 = arith.constant 0 : i32
    %c0_i32_0 = arith.constant 0 : i32
    %c0_i32_1 = arith.constant 0 : i32
    return %c0_i32, %c0_i32_0 : i32, i32
  }
  func.func @transform_3(%arg0: i32) -> (i32, i32) {
    %c0_i32 = arith.constant 0 : i32
    %c0_i32_0 = arith.constant 0 : i32
    %c0_i32_1 = arith.constant 0 : i32
    return %c0_i32, %c0_i32_0 : i32, i32
  }
  func.func @transform_4(%arg0: i32) -> (i32, i32) {
    %c0_i32 = arith.constant 0 : i32
    %c0_i32_0 = arith.constant 0 : i32
    %c0_i32_1 = arith.constant 0 : i32
    return %c0_i32, %c0_i32_0 : i32, i32
  }
  func.func @transform_5(%arg0: i32) -> (i32, i32) {
    %c0_i32 = arith.constant 0 : i32
    %c0_i32_0 = arith.constant 0 : i32
    return %arg0, %c0_i32 : i32, i32
  }
}

</mosaic_0001>

<bundles_post_ra>
// kernel: tpu_custom_call.1
= control target key start
LH: loop header
LB: loop body
LE: loop exit
PB: predicated region body
PF: predicated region fallthrough
CT: control target
= control target key end

     0   :  { %10 = vsyncpa [#allocation3], 0  ;;  %s323_s0 = inlined_call_operand.hbm [shape: bf16[8,32], index: 0, kind: input, shape index: {}]   ;;  %s324_s1 = inlined_call_operand.hbm [shape: bf16[32,32], index: 1, kind: input, shape index: {}]   ;;  %s325_s2 = inlined_call_operand.vmem [shape: f32[1,32], index: 2, kind: input, shape index: {}]   ;;  %s326_s3 = inlined_call_operand.vmem [shape: f32[1,32], index: 3, kind: input, shape index: {}]   ;;  %s327_s4 = inlined_call_operand.vmem [shape: f32[1,32], index: 4, kind: input, shape index: {}]   ;;  %s328_s5 = inlined_call_operand.hbm [shape: f32[8,32], index: 5, kind: output, shape index: {}]  }
   0x1   :  { %11 = vsyncpa [#allocation6], 0 }
   0x2   :  { %12 = vsyncpa [#allocation4], 0  ;;  %s264_s18 = smov [#allocation2]   ;;  %s265_s20 = smov [#allocation5]  }
   0x3   :  { %s19_s19 = sshll.u32 %s264_s18, 4  ;;  %s28_s21 = sshll.u32 %s265_s20, 4  ;;  %s20_s19 = int_to_ptr.vmem [resolvable:$true] %s19_s19  ;;  %s29_s21 = int_to_ptr.vmem [resolvable:$true] %s28_s21 }
   0x4   :  { %s206_s22 = scalar_lea.vmem %s20_s19, 64  ;;  %p211_p1 = scmp.lt.s32.totalorder %s20_s19, %s20_s19 }
   0x5   :  { %p207_p0 = scmp.ne.s32.totalorder %s20_s19, %s206_s22  ;;  %p212_p2 = scmp.lt.s32.totalorder %s206_s22, %s206_s22 }
   0x7   :  { %p213_p3 = por %p212_p2, %p211_p1 }
   0x9   :  { %p214_p4 = pnand %p213_p3, %p207_p0 }
   0xb   :  { %217 = shalt.err (!%p214_p4)
}
   0xc   :  { %22 = dma.hbm_to_vmem [thread:$0]  %s323_s0, 64, %s20_s19, [#allocation3]  }
   0xd   :  { %s226_s25 = scalar_lea.vmem %s29_s21, 256  ;;  %p231_p6 = scmp.lt.s32.totalorder %s29_s21, %s29_s21 }
   0xe   :  { %p227_p5 = scmp.ne.s32.totalorder %s29_s21, %s226_s25  ;;  %p232_p7 = scmp.lt.s32.totalorder %s226_s25, %s226_s25 }
  0x10   :  { %p233_p8 = por %p232_p7, %p231_p6 }
  0x12   :  { %p234_p9 = pnand %p233_p8, %p227_p5 }
  0x14   :  { %237 = shalt.err (!%p234_p9)
}
  0x15   :  { %s266_s26 = smov 64   ;;  %s267_s27 = smov 4  }
  0x16   :  { %34 = dma.hbm_to_vmem [thread:$0]  %s324_s1, 256, %s29_s21, [#allocation6], %s266_s26, %s266_s26, %s267_s27  }
  0x17   :  { %258 = dma.done.wait [#allocation3], 64  }
  0x18   :  { %259 = vsyncadd [#allocation3], 4294967232 }
  0x19   :  { %260 = dma.done.wait [#allocation6], 256  }
  0x1a   :  { %261 = vsyncadd [#allocation6], 4294967040  ;;  %v268_v0 = vmov 0.0   ;;  %vm269_vm0 = vmmov 0   ;;  %v192_v1 = vld [vmem:[#allocation5 + $0x8] sm:$0xff]   ;;  %v193_v2 = vld [vmem:[#allocation5] sm:$0xff]  }
  0x1b   :  { %177 = vmatprep.subr.bf16.mxu0 %v268_v0  ;;  %181 = vmatprep.mubr.msk.bf16.mxu0 %vm269_vm0, %v268_v0  ;;  %v48_v3 = vld [vmem:[#allocation2] sm:$0xf]  ;;  %vm72_vm1 = vcmask 261120   ;;  %s270_s8 = smov [#allocation7]  }
  0x1c   :  { %178 = vmatpush3.bf16.msra.mxu0 %v192_v1  ;;  %v168_v4 = vld [vmem:[%s325_s2] ss:$0 sm:$0xff]  ;;  %s158_s9 = sshll.u32 %s270_s8, 4  ;;  %s159_s9 = int_to_ptr.vmem [resolvable:$true] %s158_s9 }
  0x1d   :  { %179 = vmatprep.subr.bf16.mxu0 %v268_v0  ;;  %v172_v20 = vld [vmem:[%s326_s3] ss:$0 sm:$0xff]  ;;  %s238_s10 = scalar_lea.vmem %s159_s9, 128  ;;  %p243_p11 = scmp.lt.s32.totalorder %s159_s9, %s159_s9 }
  0x1e   :  { %v173_v22 = vld [vmem:[%s327_s4] ss:$0 sm:$0xff]  ;;  %p239_p10 = scmp.ne.s32.totalorder %s159_s9, %s238_s10  ;;  %p244_p12 = scmp.lt.s32.totalorder %s238_s10, %s238_s10 }
  0x20   :  { %180 = vmatpush3.bf16.msra.mxu0 %v193_v2  ;;  %p245_p13 = por %p244_p12, %p243_p11 }
  0x22   :  { %p246_p0 = pnand %p245_p13, %p239_p10 }
  0x23   :  { %182 = vmatmul.mubr.msk.bf16.vlgmr.msra.gmra.mxu0 %vm72_vm1, %v48_v3 }
  0xe3   :  { %v110_v5 = vpop.f32.mrf.mxu0 }
  0xe4   :  { %v111_v6 = vadd.f32 %v168_v4, %v110_v5 }
  0xe5   :  { %v183_v7 = vpop.f32.mrf.mxu0 }
  0xe6   :  { %v116_v8 = vsel %vm72_vm1, %v111_v6, 0.0 }
  0xe7   :  { %117 = vadd.xlane.f32.xlu0 %v116_v8  ;;  %v113_v9 = vpop.f32.mrf.mxu0 }
  0xe9   :  { %v184_v10 = vpop.f32.mrf.mxu0 }
 0x170   :  { %v118_v11 = vpop.xlane.xlu0 %117 }
 0x171   :  { %v120_v12 = vmul.f32 0.03125, %v118_v11 }
 0x173   :  { %v121_v13 = vsub.f32 %v111_v6, %v120_v12 }
 0x175   :  { %v122_v14 = vmul.f32 %v121_v13, %v121_v13 }
 0x177   :  { %v123_v15 = vsel %vm72_vm1, %v122_v14, 0.0 }
 0x178   :  { %124 = vadd.xlane.f32.xlu0 %v123_v15 }
 0x201   :  { %v125_v16 = vpop.xlane.xlu0 %124 }
 0x202   :  { %v126_v17 = vmul.f32 0.03125, %v125_v16 }
 0x204   :  { %v127_v18 = vadd.f32 1e-05, %v126_v17 }
 0x206   :  { %194 = vrsqrt.f32 %v127_v18 }
 0x213   :  { %v195_v19 = vpop.eup %194 }
 0x214   :  { %v129_v21 = vmul.f32 %v195_v19, %v121_v13 }
 0x216   :  { %v137_v23 = vmul.f32 %v172_v20, %v129_v21 }
 0x218   :  { %v145_v24 = vadd.f32 %v173_v22, %v137_v23 }
 0x21a   :  { %v147_v25 = vmul.f32 0.70710677, %v145_v24  ;;  %v146_v27 = vmul.f32 0.5, %v145_v24 }
 0x21c   :  { %196 = verf.f32 %v147_v25 }
 0x229   :  { %v197_v26 = vpop.eup %196 }
 0x22a   :  { %v149_v28 = vadd.f32 1.0, %v197_v26 }
 0x22c   :  { %v150_v29 = vmul.f32 %v149_v28, %v146_v27 }
 0x22e   :  { %151 = vst.msk [vmem:[#allocation7] sm:$0xff] %vm72_vm1, %v150_v29 }
 0x22f   :  { %249 = shalt.err (!%p246_p0)
}
 0x230   :  { %161 = dma.vmem_to_hbm [thread:$0]  %s159_s9, 128, %s328_s5, [#allocation4]  }
 0x231   :  { %262 = dma.done.wait [#allocation4], 128  }
 0x232   :  { %263 = vsyncadd [#allocation4], 4294967168 }
 0x233   :  { %165 = vsyncpa [#allocation3], 1 }
 0x234   :  { %166 = vsyncpa [#allocation6], 1 }
 0x235   :  { %167 = vsyncpa [#allocation4], 1 }

</bundles_post_ra>
